<compile_context>
chip_gen: v7x
topology: tpu7x:2x2x1
jax: 0.10.0
libtpu: 0.0.40
codegen_flags: <defaults>
</compile_context>

<pallas_src>
import functools

import jax
import jax.numpy as jnp
from jax.experimental import pallas as pl
from jax.experimental.pallas import tpu as pltpu


def _round_up(x, m):
    return (x + m - 1) // m * m


def _pad2d(x, mp, np_):
    m, n = x.shape
    return jnp.pad(x, ((0, mp - m), (0, np_ - n)))


# ------------------------- fused 4-layer MLP kernel -------------------------

def _fc_decoder_kernel(x_ref, w1_ref, b1_ref, w2_ref, b2_ref,
                       w3_ref, b3_ref, w4_hbm, b4_hbm, o_ref,
                       w4_vmem, b4_vmem, dma_sem):
    # w4 is ~75% of the bytes moved into this kernel. Start its DMA now so the
    # HBM->VMEM transfer overlaps the layer-1..3 compute.
    w4_cp = pltpu.make_async_copy(w4_hbm, w4_vmem, dma_sem.at[0])
    b4_cp = pltpu.make_async_copy(b4_hbm, b4_vmem, dma_sem.at[1])
    w4_cp.start()
    b4_cp.start()

    # Layers 1-3: Linear + Tanh (bf16 MXU operands, f32 accumulate/epilogue).
    h = jnp.tanh(jnp.dot(x_ref[...], w1_ref[...],
                         preferred_element_type=jnp.float32) + b1_ref[...])
    h = jnp.tanh(jnp.dot(h.astype(jnp.bfloat16), w2_ref[...],
                         preferred_element_type=jnp.float32) + b2_ref[...])
    h = jnp.tanh(jnp.dot(h.astype(jnp.bfloat16), w3_ref[...],
                         preferred_element_type=jnp.float32) + b3_ref[...])

    # Layer 4: Linear + Sigmoid (wait on the overlapped weight DMA first).
    w4_cp.wait()
    b4_cp.wait()
    o_ref[...] = jax.nn.sigmoid(
        jnp.dot(h.astype(jnp.bfloat16), w4_vmem[...],
                preferred_element_type=jnp.float32) + b4_vmem[...])


# --------------------------- one-time param packing --------------------------

def pack_params(params):
    """Transpose (PyTorch stores (out,in)), pad to 128-lane multiples and cast
    weights to bf16 ONCE. Reuse the returned pytree for every forward call."""
    def prep_w(w):
        k, n = w.shape[1], w.shape[0]
        kp, np_ = _round_up(k, 128), _round_up(n, 128)
        wt = jnp.transpose(w).astype(jnp.float32)
        return _pad2d(wt, kp, np_).astype(jnp.bfloat16)

    def prep_b(b):
        np_ = _round_up(b.shape[0], 128)
        return _pad2d(b.reshape(1, -1).astype(jnp.float32), 1, np_)

    packed = {}
    for i in (1, 2, 3, 4):
        packed[f'w{i}'] = prep_w(params[f'w{i}'])
        packed[f'b{i}'] = prep_b(params[f'b{i}'])
    return jax.device_put(packed)


# --------------------------------- forward ----------------------------------

@functools.partial(jax.jit, static_argnames=("n_channel",))
def fc_decoder_forward(x, packed, n_channel):
    """x: [B, n_z] f32, packed: pack_params(...) -> [B, n_channel, 28, 28] f32."""
    B, _ = x.shape
    w1, b1 = packed['w1'], packed['b1']
    w2, b2 = packed['w2'], packed['b2']
    w3, b3 = packed['w3'], packed['b3']
    w4, b4 = packed['w4'], packed['b4']
    Kp, H1p = w1.shape
    H2p, H3p, OUTp = w2.shape[1], w3.shape[1], w4.shape[1]
    OUT = 28 * 28 * n_channel

    Mp = _round_up(max(B, 16), 16)            # bf16 sublane pack = 16 rows
    x_p = _pad2d(x.astype(jnp.float32), Mp, Kp).astype(jnp.bfloat16)

    vmem = pl.BlockSpec(memory_space=pltpu.MemorySpace.VMEM)
    hbm = pl.BlockSpec(memory_space=pl.ANY)

    flops = 2 * Mp * (Kp * H1p + H1p * H2p + H2p * H3p + H3p * OUTp)
    transcendentals = Mp * (H1p + H2p + H3p + OUTp)
    bytes_accessed = (x_p.size * 2
                      + sum(v.size * v.dtype.itemsize for v in packed.values())
                      + Mp * OUTp * 4)

    out = pl.pallas_call(
        _fc_decoder_kernel,
        out_shape=jax.ShapeDtypeStruct((Mp, OUTp), jnp.float32),
        in_specs=[vmem,            # x
                  vmem, vmem,      # w1, b1
                  vmem, vmem,      # w2, b2
                  vmem, vmem,      # w3, b3
                  hbm, hbm],       # w4, b4 -> manual overlapped DMA
        out_specs=vmem,
        scratch_shapes=[pltpu.VMEM((H3p, OUTp), jnp.bfloat16),   # w4 landing buf
                        pltpu.VMEM((1, OUTp), jnp.float32),      # b4 landing buf
                        pltpu.SemaphoreType.DMA((2,))],
        cost_estimate=pl.CostEstimate(flops=flops,
                                      transcendentals=transcendentals,
                                      bytes_accessed=bytes_accessed),
    )(x_p, w1, b1, w2, b2, w3, b3, w4, b4)

    # Padded rows/cols carry tanh(bias)/sigmoid(bias) garbage; keep this slice.
    out = out[:B, :OUT]
    # Matches PyTorch x.view(-1, n_channel, 28, 28) (row-major).
    return out.reshape(B, n_channel, 28, 28)


# ------------------------------- parameters ---------------------------------

def init_params(key, n_z, n_channel, dim_h):
    keys = iter(jax.random.split(key, 16))

    def linear(out_f, in_f):
        w = 0.1 * jax.random.normal(next(keys), (out_f, in_f), jnp.float32)
        b = 0.05 * jax.random.normal(next(keys), (out_f,), jnp.float32)
        return w, b

    p = {}
    p['w1'], p['b1'] = linear(dim_h * 2, n_z)
    p['w2'], p['b2'] = linear(dim_h * 4, dim_h * 2)
    p['w3'], p['b3'] = linear(dim_h * 8, dim_h * 4)
    p['w4'], p['b4'] = linear(28 * 28 * n_channel, dim_h * 8)
    return p


def fc_decoder_ref(x, params, n_channel):
    h = jnp.tanh(x @ params['w1'].T + params['b1'])
    h = jnp.tanh(h @ params['w2'].T + params['b2'])
    h = jnp.tanh(h @ params['w3'].T + params['b3'])
    o = jax.nn.sigmoid(h @ params['w4'].T + params['b4'])
    return o.reshape(x.shape[0], n_channel, 28, 28)


if __name__ == "__main__":
    # Small shapes consistent with FcDecoder (final view hard-codes 28x28).
    n_z, n_channel, dim_h = 8, 1, 32
    batch = 2
    key = jax.random.PRNGKey(0)
    k_param, k_x = jax.random.split(key)
    params = init_params(k_param, n_z, n_channel, dim_h)
    x = jax.random.normal(k_x, (batch, n_z), jnp.float32)

    packed = pack_params(params)          # one-time packing, reused per call

    out = fc_decoder_forward(x, packed, n_channel)
    out = jax.block_until_ready(out)

    assert out.shape == (batch, n_channel, 28, 28)
    assert bool(jnp.all(jnp.isfinite(out)))
    assert bool(jnp.all((out >= 0.0) & (out <= 1.0)))   # sigmoid range

    ref = fc_decoder_ref(x, params, n_channel)
    max_err = float(jnp.max(jnp.abs(out - ref)))
    assert max_err < 5e-2, f"max abs error vs f32 reference: {max_err}"

    print("KERNEL_OK")
</pallas_src>

<mosaic_0001>
module attributes {stable_mosaic.version = 11 : i64} {
  func.func @_fc_decoder_kernel(%arg0: memref<16x128xbf16, #tpu.memory_space<vmem>>, %arg1: memref<128x128xbf16, #tpu.memory_space<vmem>>, %arg2: memref<1x128xf32, #tpu.memory_space<vmem>>, %arg3: memref<128x128xbf16, #tpu.memory_space<vmem>>, %arg4: memref<1x128xf32, #tpu.memory_space<vmem>>, %arg5: memref<128x256xbf16, #tpu.memory_space<vmem>>, %arg6: memref<1x256xf32, #tpu.memory_space<vmem>>, %arg7: memref<256x896xbf16, #tpu.memory_space<any>>, %arg8: memref<1x896xf32, #tpu.memory_space<any>>, %arg9: memref<16x896xf32, #tpu.memory_space<vmem>>, %arg10: memref<256x896xbf16, #tpu.memory_space<vmem>>, %arg11: memref<1x896xf32, #tpu.memory_space<vmem>>, %arg12: memref<2x!tpu.dma_semaphore, #tpu.memory_space<semaphore_mem>>) attributes {dimension_semantics = [], scalar_prefetch = 0 : i64, scratch_operands = 3 : i64, tpu.core_type = #tpu.core_type<tc>} {
    %c0_i32 = arith.constant 0 : i32
    %0 = tpu.memref_slice %arg12[%c0_i32] : memref<2x!tpu.dma_semaphore, #tpu.memory_space<semaphore_mem>> -> memref<1x!tpu.dma_semaphore, #tpu.memory_space<semaphore_mem>>
    %1 = tpu.memref_squeeze %0 : memref<1x!tpu.dma_semaphore, #tpu.memory_space<semaphore_mem>> -> memref<!tpu.dma_semaphore, #tpu.memory_space<semaphore_mem>>
    tpu.enqueue_dma source(%arg7 : memref<256x896xbf16, #tpu.memory_space<any>>) target(%arg10 : memref<256x896xbf16, #tpu.memory_space<vmem>>) target_semaphore(%1 : memref<!tpu.dma_semaphore, #tpu.memory_space<semaphore_mem>>)
    %c1_i32 = arith.constant 1 : i32
    %2 = tpu.memref_slice %arg12[%c1_i32] : memref<2x!tpu.dma_semaphore, #tpu.memory_space<semaphore_mem>> -> memref<1x!tpu.dma_semaphore, #tpu.memory_space<semaphore_mem>>
    %3 = tpu.memref_squeeze %2 : memref<1x!tpu.dma_semaphore, #tpu.memory_space<semaphore_mem>> -> memref<!tpu.dma_semaphore, #tpu.memory_space<semaphore_mem>>
    tpu.enqueue_dma source(%arg8 : memref<1x896xf32, #tpu.memory_space<any>>) target(%arg11 : memref<1x896xf32, #tpu.memory_space<vmem>>) target_semaphore(%3 : memref<!tpu.dma_semaphore, #tpu.memory_space<semaphore_mem>>)
    %c0 = arith.constant 0 : index
    %c0_0 = arith.constant 0 : index
    %4 = vector.load %arg0[%c0, %c0_0] : memref<16x128xbf16, #tpu.memory_space<vmem>>, vector<16x128xbf16>
    %c0_1 = arith.constant 0 : index
    %c0_2 = arith.constant 0 : index
    %5 = vector.load %arg1[%c0_1, %c0_2] : memref<128x128xbf16, #tpu.memory_space<vmem>>, vector<128x128xbf16>
    %cst = arith.constant dense<0.000000e+00> : vector<16x128xf32>
    %6 = tpu.matmul %4, %5, %cst {dimension_numbers = #tpu.dot_dimension_numbers<[1], [0], [0], [1], [0, 0, 1, 1], [], []>} : vector<16x128xbf16>, vector<128x128xbf16>, vector<16x128xf32> -> vector<16x128xf32>
    %c0_3 = arith.constant 0 : index
    %c0_4 = arith.constant 0 : index
    %7 = vector.load %arg2[%c0_3, %c0_4] : memref<1x128xf32, #tpu.memory_space<vmem>>, vector<1x128xf32>
    %8 = vector.broadcast %7 : vector<1x128xf32> to vector<16x128xf32>
    %9 = arith.addf %6, %8 : vector<16x128xf32>
    %10 = math.tanh %9 : vector<16x128xf32>
    %11 = arith.truncf %10 : vector<16x128xf32> to vector<16x128xbf16>
    %c0_5 = arith.constant 0 : index
    %c0_6 = arith.constant 0 : index
    %12 = vector.load %arg3[%c0_5, %c0_6] : memref<128x128xbf16, #tpu.memory_space<vmem>>, vector<128x128xbf16>
    %cst_7 = arith.constant dense<0.000000e+00> : vector<16x128xf32>
    %13 = tpu.matmul %11, %12, %cst_7 {dimension_numbers = #tpu.dot_dimension_numbers<[1], [0], [0], [1], [0, 0, 1, 1], [], []>} : vector<16x128xbf16>, vector<128x128xbf16>, vector<16x128xf32> -> vector<16x128xf32>
    %c0_8 = arith.constant 0 : index
    %c0_9 = arith.constant 0 : index
    %14 = vector.load %arg4[%c0_8, %c0_9] : memref<1x128xf32, #tpu.memory_space<vmem>>, vector<1x128xf32>
    %15 = vector.broadcast %14 : vector<1x128xf32> to vector<16x128xf32>
    %16 = arith.addf %13, %15 : vector<16x128xf32>
    %17 = math.tanh %16 : vector<16x128xf32>
    %18 = arith.truncf %17 : vector<16x128xf32> to vector<16x128xbf16>
    %c0_10 = arith.constant 0 : index
    %c0_11 = arith.constant 0 : index
    %19 = vector.load %arg5[%c0_10, %c0_11] : memref<128x256xbf16, #tpu.memory_space<vmem>>, vector<128x256xbf16>
    %cst_12 = arith.constant dense<0.000000e+00> : vector<16x256xf32>
    %20 = tpu.matmul %18, %19, %cst_12 {dimension_numbers = #tpu.dot_dimension_numbers<[1], [0], [0], [1], [0, 0, 1, 1], [], []>} : vector<16x128xbf16>, vector<128x256xbf16>, vector<16x256xf32> -> vector<16x256xf32>
    %c0_13 = arith.constant 0 : index
    %c0_14 = arith.constant 0 : index
    %21 = vector.load %arg6[%c0_13, %c0_14] : memref<1x256xf32, #tpu.memory_space<vmem>>, vector<1x256xf32>
    %22 = vector.broadcast %21 : vector<1x256xf32> to vector<16x256xf32>
    %23 = arith.addf %20, %22 : vector<16x256xf32>
    %24 = math.tanh %23 : vector<16x256xf32>
    %c0_i32_15 = arith.constant 0 : i32
    %25 = tpu.memref_slice %arg12[%c0_i32_15] : memref<2x!tpu.dma_semaphore, #tpu.memory_space<semaphore_mem>> -> memref<1x!tpu.dma_semaphore, #tpu.memory_space<semaphore_mem>>
    %26 = tpu.memref_squeeze %25 : memref<1x!tpu.dma_semaphore, #tpu.memory_space<semaphore_mem>> -> memref<!tpu.dma_semaphore, #tpu.memory_space<semaphore_mem>>
    tpu.wait_dma2 semaphore(%26 : memref<!tpu.dma_semaphore, #tpu.memory_space<semaphore_mem>>) src(%arg7 : memref<256x896xbf16, #tpu.memory_space<any>>) dst(%arg10 : memref<256x896xbf16, #tpu.memory_space<vmem>>)
    %c1_i32_16 = arith.constant 1 : i32
    %27 = tpu.memref_slice %arg12[%c1_i32_16] : memref<2x!tpu.dma_semaphore, #tpu.memory_space<semaphore_mem>> -> memref<1x!tpu.dma_semaphore, #tpu.memory_space<semaphore_mem>>
    %28 = tpu.memref_squeeze %27 : memref<1x!tpu.dma_semaphore, #tpu.memory_space<semaphore_mem>> -> memref<!tpu.dma_semaphore, #tpu.memory_space<semaphore_mem>>
    tpu.wait_dma2 semaphore(%28 : memref<!tpu.dma_semaphore, #tpu.memory_space<semaphore_mem>>) src(%arg8 : memref<1x896xf32, #tpu.memory_space<any>>) dst(%arg11 : memref<1x896xf32, #tpu.memory_space<vmem>>)
    %29 = arith.truncf %24 : vector<16x256xf32> to vector<16x256xbf16>
    %c0_17 = arith.constant 0 : index
    %c0_18 = arith.constant 0 : index
    %30 = vector.load %arg10[%c0_17, %c0_18] : memref<256x896xbf16, #tpu.memory_space<vmem>>, vector<256x896xbf16>
    %cst_19 = arith.constant dense<0.000000e+00> : vector<16x896xf32>
    %31 = tpu.matmul %29, %30, %cst_19 {dimension_numbers = #tpu.dot_dimension_numbers<[1], [0], [0], [1], [0, 0, 1, 1], [], []>} : vector<16x256xbf16>, vector<256x896xbf16>, vector<16x896xf32> -> vector<16x896xf32>
    %c0_20 = arith.constant 0 : index
    %c0_21 = arith.constant 0 : index
    %32 = vector.load %arg11[%c0_20, %c0_21] : memref<1x896xf32, #tpu.memory_space<vmem>>, vector<1x896xf32>
    %33 = vector.broadcast %32 : vector<1x896xf32> to vector<16x896xf32>
    %34 = arith.addf %31, %33 : vector<16x896xf32>
    %35 = arith.negf %34 : vector<16x896xf32>
    %36 = math.exp %35 : vector<16x896xf32>
    %cst_22 = arith.constant 1.000000e+00 : f32
    %37 = vector.broadcast %cst_22 : f32 to vector<16x896xf32>
    %38 = arith.addf %37, %36 : vector<16x896xf32>
    %39 = arith.divf %37, %38 : vector<16x896xf32>
    %c0_23 = arith.constant 0 : index
    %c0_24 = arith.constant 0 : index
    %40 = vector.load %arg9[%c0_23, %c0_24] : memref<16x896xf32, #tpu.memory_space<vmem>>, vector<16x896xf32>
    tpu.vector_store %arg9[%c0_23, %c0_24], %39 {strides = array<i32>} : memref<16x896xf32, #tpu.memory_space<vmem>>, vector<16x896xf32>,
    return
  }
}

</mosaic_0001>

<bundles_post_ra>
// kernel: fc_decoder_forward.1
= control target key start
LH: loop header
LB: loop body
LE: loop exit
PB: predicated region body
PF: predicated region fallthrough
CT: control target
= control target key end

     0   :  { %14 = vsyncpa [#allocation6], 0  ;;  %s1558_s0 = inlined_call_operand.vmem [shape: bf16[16,128], index: 0, kind: input, shape index: {}]   ;;  %s1559_s1 = inlined_call_operand.hbm [shape: bf16[128,128], index: 1, kind: input, shape index: {}]   ;;  %s1560_s2 = inlined_call_operand.vmem [shape: f32[1,128], index: 2, kind: input, shape index: {}]   ;;  %s1561_s3 = inlined_call_operand.hbm [shape: bf16[128,128], index: 3, kind: input, shape index: {}]   ;;  %s1562_s4 = inlined_call_operand.vmem [shape: f32[1,128], index: 4, kind: input, shape index: {}]   ;;  %s1563_s5 = inlined_call_operand.hbm [shape: bf16[128,256], index: 5, kind: input, shape index: {}]   ;;  %s1564_s6 = inlined_call_operand.vmem [shape: f32[1,256], index: 6, kind: input, shape index: {}]   ;;  %s1565_s7 = inlined_call_operand.hbm [shape: bf16[256,896], index: 7, kind: input, shape index: {}]   ;;  %s1566_s8 = inlined_call_operand.vmem [shape: f32[1,896], index: 8, kind: input, shape index: {}]   ;;  %s1567_s9 = inlined_call_operand.vmem [shape: f32[16,896], index: 9, kind: output, shape index: {}]  }
   0x1   :  { %15 = vsyncpa [#allocation8], 0  ;;  %s1335_s30 = smov [#allocation7]   ;;  %s1336_s11 = smov [#allocation5]  }
   0x2   :  { %s37_s10 = sshll.u32 %s1335_s30, 4  ;;  %s23_s12 = sshll.u32 %s1336_s11, 4  ;;  %s38_s10 = int_to_ptr.vmem [resolvable:$true] %s37_s10  ;;  %s1402_s12 = int_to_ptr.vmem [resolvable:$true] %s23_s12 }
   0x3   :  { %s1261_s15 = scalar_lea.hbm %s1561_s3, 1024 }
   0x4   :  { %p1262_p0 = scmp.ne.s32.totalorder %s1561_s3, %s1261_s15  ;;  %p1265_p1 = scmp.lt.u32.totalorder %s1261_s15, %s1561_s3 }
   0x6   :  { %p1267_p2 = pnand %p1265_p1, %p1262_p0 }
   0x8   :  { %1270 = shalt.err (!%p1267_p2)
}
   0x9   :  { %s1271_s20 = scalar_lea.vmem %s38_s10, 1024  ;;  %p1276_p4 = scmp.lt.s32.totalorder %s38_s10, %s38_s10 }
   0xa   :  { %p1272_p3 = scmp.ne.s32.totalorder %s38_s10, %s1271_s20  ;;  %p1277_p5 = scmp.lt.s32.totalorder %s1271_s20, %s1271_s20 }
   0xc   :  { %p1278_p6 = por %p1277_p5, %p1276_p4 }
   0xe   :  { %p1279_p7 = pnand %p1278_p6, %p1272_p3 }
  0x10   :  { %1282 = shalt.err (!%p1279_p7)
}
  0x11   :  { %s1337_s21 = smov 64   ;;  %s1338_s22 = smov 4  }
  0x12   :  { %43 = dma.hbm_to_vmem [thread:$0]  %s1561_s3, 1024, %s38_s10, [#allocation8], %s1337_s21, %s1337_s21, %s1338_s22  }
  0x13   :  { %s1283_s27 = scalar_lea.hbm %s1559_s1, 1024 }
  0x14   :  { %p1284_p8 = scmp.ne.s32.totalorder %s1559_s1, %s1283_s27  ;;  %p1287_p9 = scmp.lt.u32.totalorder %s1283_s27, %s1559_s1 }
  0x16   :  { %p1289_p10 = pnand %p1287_p9, %p1284_p8 }
  0x18   :  { %1292 = shalt.err (!%p1289_p10)
}
  0x19   :  { %s1293_s13 = scalar_lea.vmem %s1402_s12, 1024  ;;  %p1298_p12 = scmp.lt.s32.totalorder %s1402_s12, %s1402_s12 }
  0x1a   :  { %p1294_p11 = scmp.ne.s32.totalorder %s1402_s12, %s1293_s13  ;;  %p1299_p13 = scmp.lt.s32.totalorder %s1293_s13, %s1293_s13 }
  0x1c   :  { %p1300_p0 = por %p1299_p13, %p1298_p12 }
  0x1e   :  { %p1301_p1 = pnand %p1300_p0, %p1294_p11 }
  0x20   :  { %1304 = shalt.err (!%p1301_p1)
}
  0x21   :  { %29 = dma.hbm_to_vmem [thread:$0]  %s1559_s1, 1024, %s1402_s12, [#allocation6], %s1337_s21, %s1337_s21, %s1338_s22  }
  0x22   :  { %s1339_s14 = smov [#allocation9]   ;;  %s1305_s18 = scalar_lea.hbm %s1563_s5, 2048 }
  0x23   :  { %s51_s15 = sshll.u32 %s1339_s14, 4  ;;  %p1306_p2 = scmp.ne.s32.totalorder %s1563_s5, %s1305_s18  ;;  %s52_s15 = int_to_ptr.vmem [resolvable:$true] %s51_s15 }
  0x24   :  { %p1309_p3 = scmp.lt.u32.totalorder %s1305_s18, %s1563_s5 }
  0x26   :  { %p1311_p4 = pnand %p1309_p3, %p1306_p2 }
  0x28   :  { %1314 = shalt.err (!%p1311_p4)
}
  0x29   :  { %s1315_s25 = scalar_lea.vmem %s52_s15, 2048  ;;  %p1320_p6 = scmp.lt.s32.totalorder %s52_s15, %s52_s15 }
  0x2a   :  { %p1316_p5 = scmp.ne.s32.totalorder %s52_s15, %s1315_s25  ;;  %p1321_p7 = scmp.lt.s32.totalorder %s1315_s25, %s1315_s25 }
  0x2c   :  { %p1322_p8 = por %p1321_p7, %p1320_p6 }
  0x2e   :  { %p1323_p9 = pnand %p1322_p8, %p1316_p5 }
  0x30   :  { %1326 = shalt.err (!%p1323_p9)
}
  0x31   :  { %s1340_s1 = smov 128   ;;  %s1341_s12 = smov 8  }
  0x32   :  { %57 = dma.hbm_to_vmem [thread:$0]  %s1563_s5, 2048, %s52_s15, [#allocation8], %s1340_s1, %s1340_s1, %s1341_s12  }
  0x33   :  { %1327 = dma.done.wait [#allocation6], 1024  }
  0x34   :  { %1328 = vsyncadd [#allocation6], 4294966272 }
  0x35   :  { %1329 = dma.done.wait [#allocation8], 3072  }
  0x36   :  { %1330 = vsyncadd [#allocation8], 4294964224  ;;  %s74_s28 = sld [smem:[#allocation0]]   ;;  %s1342_s29 = smov 896  }
  0x37   :  { %86 = sst [smem:[#allocation11]] %s1342_s29  ;;  %s1343_s30 = smov 7  }
  0x38   :  { %88 = sst [smem:[#allocation11 + $0x1]] %s1342_s29  ;;  %s1344_s11 = smov [#allocation2]  }
  0x39   :  { %90 = sst [smem:[#allocation11 + $0x2]] %s1343_s30  ;;  %s82_s13 = sshll.u32 %s1344_s11, 4  ;;  %s83_s13 = int_to_ptr.vmem [resolvable:$true] %s82_s13 }
  0x3a   :  { %92 = sst [smem:[#allocation11 + $0x3]] %s1337_s21  ;;  %s1345_s3 = smov 2  }
  0x3b   :  { %94 = sst [smem:[#allocation11 + $0x4]] %s1340_s1  ;;  %s1346_s5 = smov 448  }
  0x3c   :  { %96 = sst [smem:[#allocation11 + $0x5]] %s1345_s3  ;;  %s998_s10 = sshll.u32 %s74_s28, 26 }
  0x3d   :  { %98 = sst [smem:[#allocation11 + $0x6]] %s1346_s5  ;;  %s999_s14 = sadd.s32 134217728, %s998_s10 }
  0x3e   :  { %100 = sst [smem:[#allocation11 + $0x7]] %s1337_s21  ;;  %s1347_s15 = smov [#allocation4]  }
  0x3f   :  { %102 = sst [smem:[#allocation11 + $0x8]] %s1338_s22  ;;  %s1348_s16 = smov [#allocation10]  }
  0x40   :  { %104 = dma.general %s1565_s7, 14336, %s83_s13, %s1347_s15, %s1348_s16, [#allocation11], %s999_s14, 0  }
  0x41   :  { %v123_v0 = vld [vmem:[%s1566_s8] sm:$0x7f] }
  0x42   :  { %124 = vst [vmem:[#allocation3] sm:$0x7f] %v123_v0 }
  0x43   :  { %149 = vsyncadd [#allocation4 + $0x1], 112  ;;  %v1148_v1 = vld [vmem:[#allocation5] sm:$0xff]   ;;  %v1349_v2 = vmov 0.0   ;;  %v1149_v3 = vld [vmem:[#allocation5 + $0x8] sm:$0xff]   ;;  %vm1350_vm0 = vmmov 0   ;;  %v406_v56 = vlaneseq }
  0x44   :  { %1091 = vmatprep.subr.bf16.mxu0 %v1349_v2  ;;  %1111 = vmatprep.subr.bf16.mxu1 %v1349_v2  ;;  %v1150_v4 = vld [vmem:[#allocation5 + $0x10] sm:$0xff]   ;;  %v1151_v5 = vld [vmem:[#allocation5 + $0x18] sm:$0xff]   ;;  %v1157_v6 = vld [vmem:[#allocation7] sm:$0xff]   ;;  %v1351_v43 = vmov 0  }
  0x45   :  { %1092 = vmatpush3.bf16.msra.mxu0 %v1148_v1  ;;  %1107 = vmatprep.mubr.msk.bf16.mxu0 %vm1350_vm0, %v1349_v2  ;;  %v1158_v7 = vld [vmem:[#allocation7 + $0x8] sm:$0xff]   ;;  %v1152_v8 = vld [vmem:[#allocation5 + $0x20] sm:$0xff]   ;;  %v1159_v9 = vld [vmem:[#allocation7 + $0x10] sm:$0xff]   ;;  %v1469_v57 = vshrl.u32 %v406_v56, 7 }
  0x46   :  { %1093 = vmatprep.subr.bf16.mxu0 %v1349_v2  ;;  %1127 = vmatprep.mubr.msk.bf16.mxu1 %vm1350_vm0, %v1349_v2  ;;  %v1153_v10 = vld [vmem:[#allocation5 + $0x28] sm:$0xff]   ;;  %v1160_v11 = vld [vmem:[#allocation7 + $0x18] sm:$0xff]   ;;  %v1154_v12 = vld [vmem:[#allocation5 + $0x30] sm:$0xff]  }
  0x47   :  { %1112 = vmatpush3.bf16.msra.mxu1 %v1157_v6  ;;  %v1155_v13 = vld [vmem:[#allocation5 + $0x38] sm:$0xff]   ;;  %v1161_v15 = vld [vmem:[#allocation7 + $0x20] sm:$0xff]   ;;  %v1162_v16 = vld [vmem:[#allocation7 + $0x28] sm:$0xff]   ;;  %v408_v58 = vsub.s32 0, %v1469_v57  ;;  %v412_v60 = vsub.s32 1, %v1469_v57 }
  0x48   :  { %1113 = vmatprep.subr.bf16.mxu1 %v1349_v2  ;;  %v1156_v14 = vld [vmem:[%s1558_s0] sm:$0xff]   ;;  %v1163_v17 = vld [vmem:[#allocation7 + $0x30] sm:$0xff]   ;;  %v1167_v20 = vld [vmem:[#allocation9 + $0x4] ss:$8 sps:$4 sm:$0xff]  }
  0x49   :  { %1094 = vmatpush3.bf16.msra.mxu0 %v1149_v3  ;;  %v1164_v18 = vld [vmem:[#allocation7 + $0x38] sm:$0xff]   ;;  %v1165_v19 = vld [vmem:[#allocation9] ss:$8 sps:$4 sm:$0xff]   ;;  %v1173_v23 = vld [vmem:[#allocation9 + $0x24] ss:$8 sps:$4 sm:$0xff]  }
  0x4a   :  { %1095 = vmatprep.subr.bf16.mxu0 %v1349_v2  ;;  %v1170_v21 = vld [vmem:[#allocation9 + $0x14] ss:$8 sps:$4 sm:$0xff]   ;;  %v1168_v22 = vld [vmem:[#allocation9 + $0x10] ss:$8 sps:$4 sm:$0xff]   ;;  %v1171_v24 = vld [vmem:[#allocation9 + $0x20] ss:$8 sps:$4 sm:$0xff]  }
  0x4b   :  { %1114 = vmatpush3.bf16.msra.mxu1 %v1158_v7  ;;  %v1176_v25 = vld [vmem:[#allocation9 + $0x34] ss:$8 sps:$4 sm:$0xff]   ;;  %v1174_v26 = vld [vmem:[#allocation9 + $0x30] ss:$8 sps:$4 sm:$0xff]   ;;  %v1179_v37 = vld [vmem:[#allocation9 + $0x44] ss:$8 sps:$4 sm:$0xff]  }
  0x4c   :  { %1115 = vmatprep.subr.bf16.mxu1 %v1349_v2  ;;  %v1000_v27 = vld [vmem:[%s1560_s2] ss:$0 sm:$0xff]  ;;  %v1177_v38 = vld [vmem:[#allocation9 + $0x40] ss:$8 sps:$4 sm:$0xff]   ;;  %v1182_v39 = vld [vmem:[#allocation9 + $0x54] ss:$8 sps:$4 sm:$0xff]  }
  0x4d   :  { %1096 = vmatpush3.bf16.msra.mxu0 %v1150_v4  ;;  %v1180_v40 = vld [vmem:[#allocation9 + $0x50] ss:$8 sps:$4 sm:$0xff]   ;;  %v1185_v41 = vld [vmem:[#allocation9 + $0x64] ss:$8 sps:$4 sm:$0xff]   ;;  %v1183_v42 = vld [vmem:[#allocation9 + $0x60] ss:$8 sps:$4 sm:$0xff]  }
  0x4e   :  { %1097 = vmatprep.subr.bf16.mxu0 %v1349_v2  ;;  %v1188_v44 = vld [vmem:[#allocation9 + $0x74] ss:$8 sps:$4 sm:$0xff]   ;;  %v1186_v45 = vld [vmem:[#allocation9 + $0x70] ss:$8 sps:$4 sm:$0xff]  }
  0x4f   :  { %1116 = vmatpush3.bf16.msra.mxu1 %v1159_v9  ;;  %v1010_v46 = vld [vmem:[%s1562_s4] ss:$0 sm:$0xff] }
  0x50   :  { %1117 = vmatprep.subr.bf16.mxu1 %v1349_v2  ;;  %v404_v59 = vld [vmem:[%s1564_s6] sm:$0x3] }
  0x51   :  { %1098 = vmatpush3.bf16.msra.mxu0 %v1151_v5  ;;  %v409_v61 = vrot.slane %v404_v59, %v408_v58  ;;  %v413_v62 = vrot.slane %v404_v59, %v412_v60 }
  0x52   :  { %1099 = vmatprep.subr.bf16.mxu0 %v1349_v2 }
  0x53   :  { %1118 = vmatpush3.bf16.msra.mxu1 %v1160_v11 }
  0x54   :  { %1119 = vmatprep.subr.bf16.mxu1 %v1349_v2 }
  0x55   :  { %1100 = vmatpush3.bf16.msra.mxu0 %v1152_v8 }
  0x56   :  { %1101 = vmatprep.subr.bf16.mxu0 %v1349_v2 }
  0x57   :  { %1120 = vmatpush3.bf16.msra.mxu1 %v1161_v15 }
  0x58   :  { %1121 = vmatprep.subr.bf16.mxu1 %v1349_v2 }
  0x59   :  { %1102 = vmatpush3.bf16.msra.mxu0 %v1153_v10 }
  0x5a   :  { %1103 = vmatprep.subr.bf16.mxu0 %v1349_v2 }
  0x5b   :  { %1122 = vmatpush3.bf16.msra.mxu1 %v1162_v16 }
  0x5c   :  { %1123 = vmatprep.subr.bf16.mxu1 %v1349_v2 }
  0x5d   :  { %1104 = vmatpush3.bf16.msra.mxu0 %v1154_v12 }
  0x5e   :  { %1105 = vmatprep.subr.bf16.mxu0 %v1349_v2 }
  0x5f   :  { %1124 = vmatpush3.bf16.msra.mxu1 %v1163_v17 }
  0x60   :  { %1125 = vmatprep.subr.bf16.mxu1 %v1349_v2 }
  0x61   :  { %1106 = vmatpush3.bf16.msra.mxu0 %v1155_v13 }
  0x62   :  { %496 = vmatprep.subr.bf16.mxu0 %v1167_v20 }
  0x63   :  { %1126 = vmatpush3.bf16.msra.mxu1 %v1164_v18 }
  0x64   :  { %1108 = vmatmul.mubr.bf16.vlgmr.msra.gmra.mrb[0].mxu0 %v1156_v14 }
  0x65   :  { %497 = vmatpush1.bf16.msra.mxu0 %v1165_v19  ;;  %528 = vmatprep.mubr.bf16.mxu0 %v1351_v43 }
  0x66   :  { %498 = vmatprep.subr.bf16.mxu0 %v1170_v21 }
  0x69   :  { %499 = vmatpush1.bf16.msra.mxu0 %v1168_v22 }
  0x6a   :  { %500 = vmatprep.subr.bf16.mxu0 %v1173_v23 }
  0x6d   :  { %501 = vmatpush1.bf16.msra.mxu0 %v1171_v24 }
  0x6e   :  { %502 = vmatprep.subr.bf16.mxu0 %v1176_v25 }
  0x71   :  { %503 = vmatpush1.bf16.msra.mxu0 %v1174_v26 }
  0x72   :  { %504 = vmatprep.subr.bf16.mxu0 %v1179_v37 }
  0x75   :  { %505 = vmatpush1.bf16.msra.mxu0 %v1177_v38 }
  0x76   :  { %506 = vmatprep.subr.bf16.mxu0 %v1182_v39 }
  0x79   :  { %507 = vmatpush1.bf16.msra.mxu0 %v1180_v40 }
  0x7a   :  { %508 = vmatprep.subr.bf16.mxu0 %v1185_v41 }
  0x7d   :  { %509 = vmatpush1.bf16.msra.mxu0 %v1183_v42 }
  0x7e   :  { %510 = vmatprep.subr.bf16.mxu0 %v1188_v44 }
  0x81   :  { %511 = vmatpush1.bf16.msra.mxu0 %v1186_v45 }
 0x137   :  { %v263_v28 = vpop.f32.mrb[0].mxu0 }
 0x138   :  { %v264_v29 = vadd.f32 %v1000_v27, %v263_v28  ;;  %v1109_v30 = vpop.f32.mrb[1].mxu0 }
 0x139   :  { %v266_v31 = vpop.f32.mrb[2].mxu0 }
 0x13a   :  { %v267_v32 = vadd.f32 %v1000_v27, %v266_v31  ;;  %v1110_v33 = vpop.f32.mrb[3].mxu0  ;;  %1189 = vtanh.f32 %v264_v29 }
 0x13c   :  { %1191 = vtanh.f32 %v267_v32 }
 0x144   :  { %v1190_v34 = vpop.eup %1189 }
 0x146   :  { %v1192_v35 = vpop.eup %1191 }
 0x147   :  { %v272_v36 = vpack.c.bf16 %v1192_v35, %v1190_v34 }
 0x149   :  { %1128 = vmatmul.mubr.bf16.vlgmr.msra.gmra.mrb[0].mxu1 %v272_v36 }
 0x21c   :  { %v378_v47 = vpop.f32.mrb[0].mxu1 }
 0x21d   :  { %v379_v48 = vadd.f32 %v1010_v46, %v378_v47  ;;  %v1129_v49 = vpop.f32.mrb[1].mxu1 }
 0x21e   :  { %v381_v50 = vpop.f32.mrb[2].mxu1 }
 0x21f   :  { %v382_v51 = vadd.f32 %v1010_v46, %v381_v50  ;;  %v1130_v52 = vpop.f32.mrb[3].mxu1  ;;  %1193 = vtanh.f32 %v379_v48 }
 0x221   :  { %1195 = vtanh.f32 %v382_v51 }
 0x229   :  { %v1194_v53 = vpop.eup %1193 }
 0x22b   :  { %v1196_v54 = vpop.eup %1195 }
 0x22c   :  { %v387_v55 = vpack.c.bf16 %v1196_v54, %v1194_v53 }
 0x22e   :  { %529 = vmatmul.mubr.bf16.vlgmr.msra.gmra.mrb[4].mxu0 %v387_v55 }
 0x301   :  { %v530_v63 = vpop.f32.mrb[4].mxu0 }
 0x302   :  { %v531_v0 = vadd.f32 %v530_v63, %v409_v61  ;;  %v532_v1 = vpop.f32.mrb[5].mxu0 }
 0x303   :  { %v533_v2 = vadd.f32 %v532_v1, %v413_v62  ;;  %v534_v3 = vpop.f32.mrb[6].mxu0 }
 0x304   :  { %1197 = vtanh.f32 %v531_v0  ;;  %v535_v4 = vadd.f32 %v534_v3, %v409_v61  ;;  %v536_v5 = vpop.f32.mrb[7].mxu0 }
 0x305   :  { %1199 = vtanh.f32 %v533_v2  ;;  %v537_v6 = vadd.f32 %v536_v5, %v413_v62 }
 0x306   :  { %1201 = vtanh.f32 %v535_v4 }
 0x307   :  { %1203 = vtanh.f32 %v537_v6 }
 0x30e   :  { %v1480_v7 = vpop.eup %1197 }
 0x30f   :  { %v1200_v8 = vpop.eup %1199 }
 0x310   :  { %v1482_v9 = vpop.eup %1201 }
 0x311   :  { %v1204_v10 = vpop.eup %1203 }
 0x312   :  { %1331 = dma.done.wait [#allocation4], 14336 }
 0x313   :  { %1332 = vsyncadd [#allocation4], 4294952960 }
 0x314   :  { %1333 = dma.done.wait [#allocation4 + $0x1], 112 }
 0x315   :  { %1334 = vsyncadd [#allocation4 + $0x1], 4294967184  ;;  %v1484_v11 = vpack.c.bf16 %v1204_v10, %v1200_v8  ;;  %v553_v12 = vld [vmem:[#allocation2 + $0x8] sm:$0xff]  ;;  %v552_v13 = vld [vmem:[#allocation2] sm:$0xff] }
 0x316   :  { %v560_v14 = vld [vmem:[#allocation2 + $0x40] sm:$0xff]  ;;  %701 = vmatprep.subr.bf16.mxu1 %v553_v12  ;;  %v559_v15 = vld [vmem:[#allocation2 + $0x38] sm:$0xff]  ;;  %v554_v18 = vld [vmem:[#allocation2 + $0x10] sm:$0xff] }
 0x317   :  { %733 = vmatprep.mubr.bf16.mxu1 %v1484_v11  ;;  %776 = vmatprep.mubr.bf16.mxu0 %v1484_v11  ;;  %v567_v16 = vld [vmem:[#allocation2 + $0x78] sm:$0xff]  ;;  %v562_v19 = vld [vmem:[#allocation2 + $0x50] sm:$0xff]  ;;  %v561_v21 = vld [vmem:[#allocation2 + $0x48] sm:$0xff] }
 0x318   :  { %702 = vmatpush1.bf16.msra.mxu1 %v552_v13  ;;  %v555_v17 = vld [vmem:[#allocation2 + $0x18] sm:$0xff]  ;;  %v566_v20 = vld [vmem:[#allocation2 + $0x70] sm:$0xff]  ;;  %v569_v23 = vld [vmem:[#allocation2 + $0x88] sm:$0xff] }
 0x319   :  { %703 = vmatprep.subr.bf16.mxu1 %v560_v14  ;;  %744 = vmatprep.subr.bf16.mxu0 %v555_v17  ;;  %v574_v22 = vld [vmem:[#allocation2 + $0xb0] sm:$0xff]  ;;  %v573_v24 = vld [vmem:[#allocation2 + $0xa8] sm:$0xff]  ;;  %v568_v25 = vld [vmem:[#allocation2 + $0x80] sm:$0xff] }
 0x31a   :  { %745 = vmatpush1.bf16.msra.mxu0 %v554_v18  ;;  %v581_v26 = vld [vmem:[#allocation2 + $0xe8] sm:$0xff]  ;;  %v576_v27 = vld [vmem:[#allocation2 + $0xc0] sm:$0xff]  ;;  %v575_v29 = vld [vmem:[#allocation2 + $0xb8] sm:$0xff]  ;;  %v1490_v18 = vpack.c.bf16 %v1482_v9, %v1480_v7 }
 0x31b   :  { %746 = vmatprep.subr.bf16.mxu0 %v562_v19  ;;  %v580_v28 = vld [vmem:[#allocation2 + $0xe0] sm:$0xff]  ;;  %v583_v31 = vld [vmem:[#allocation2 + $0xf8] sm:$0xff]  ;;  %v582_v33 = vld [vmem:[#allocation2 + $0xf0] sm:$0xff] }
 0x31c   :  { %704 = vmatpush1.bf16.msra.mxu1 %v559_v15  ;;  %v588_v30 = vld [vmem:[#allocation2 + $0x120] sm:$0xff]  ;;  %v587_v32 = vld [vmem:[#allocation2 + $0x118] sm:$0xff]  ;;  %v590_v35 = vld [vmem:[#allocation2 + $0x130] sm:$0xff] }
 0x31d   :  { %705 = vmatprep.subr.bf16.mxu1 %v567_v16  ;;  %v595_v34 = vld [vmem:[#allocation2 + $0x158] sm:$0xff]  ;;  %v594_v36 = vld [vmem:[#allocation2 + $0x150] sm:$0xff]  ;;  %v589_v37 = vld [vmem:[#allocation2 + $0x128] sm:$0xff] }
 0x31e   :  { %747 = vmatpush1.bf16.msra.mxu0 %v561_v21  ;;  %v602_v38 = vld [vmem:[#allocation2 + $0x190] sm:$0xff]  ;;  %v597_v39 = vld [vmem:[#allocation2 + $0x168] sm:$0xff]  ;;  %v596_v41 = vld [vmem:[#allocation2 + $0x160] sm:$0xff] }
 0x31f   :  { %748 = vmatprep.subr.bf16.mxu0 %v569_v23  ;;  %v601_v40 = vld [vmem:[#allocation2 + $0x188] sm:$0xff]  ;;  %v604_v43 = vld [vmem:[#allocation2 + $0x1a0] sm:$0xff]  ;;  %v603_v45 = vld [vmem:[#allocation2 + $0x198] sm:$0xff] }
 0x320   :  { %706 = vmatpush1.bf16.msra.mxu1 %v566_v20  ;;  %v609_v42 = vld [vmem:[#allocation2 + $0x1c8] sm:$0xff]  ;;  %v608_v44 = vld [vmem:[#allocation2 + $0x1c0] sm:$0xff]  ;;  %v611_v47 = vld [vmem:[#allocation2 + $0x1d8] sm:$0xff] }
 0x321   :  { %707 = vmatprep.subr.bf16.mxu1 %v574_v22  ;;  %v616_v46 = vld [vmem:[#allocation2 + $0x200] sm:$0xff]  ;;  %v615_v48 = vld [vmem:[#allocation2 + $0x1f8] sm:$0xff]  ;;  %v610_v49 = vld [vmem:[#allocation2 + $0x1d0] sm:$0xff] }
 0x322   :  { %749 = vmatpush1.bf16.msra.mxu0 %v568_v25  ;;  %v623_v50 = vld [vmem:[#allocation2 + $0x238] sm:$0xff]  ;;  %v618_v51 = vld [vmem:[#allocation2 + $0x210] sm:$0xff]  ;;  %v617_v53 = vld [vmem:[#allocation2 + $0x208] sm:$0xff] }
 0x323   :  { %750 = vmatprep.subr.bf16.mxu0 %v576_v27  ;;  %v622_v52 = vld [vmem:[#allocation2 + $0x230] sm:$0xff]  ;;  %v625_v55 = vld [vmem:[#allocation2 + $0x248] sm:$0xff]  ;;  %v624_v59 = vld [vmem:[#allocation2 + $0x240] sm:$0xff] }
 0x324   :  { %708 = vmatpush1.bf16.msra.mxu1 %v573_v24  ;;  %v630_v54 = vld [vmem:[#allocation2 + $0x270] sm:$0xff]  ;;  %v629_v56 = vld [vmem:[#allocation2 + $0x268] sm:$0xff]  ;;  %v632_v62 = vld [vmem:[#allocation2 + $0x280] sm:$0xff] }
 0x325   :  { %709 = vmatprep.subr.bf16.mxu1 %v581_v26  ;;  %v637_v61 = vld [vmem:[#allocation2 + $0x2a8] sm:$0xff]  ;;  %v636_v63 = vld [vmem:[#allocation2 + $0x2a0] sm:$0xff]  ;;  %v631_v0 = vld [vmem:[#allocation2 + $0x278] sm:$0xff] }
 0x326   :  { %751 = vmatpush1.bf16.msra.mxu0 %v575_v29  ;;  %v644_v1 = vld [vmem:[#allocation2 + $0x2e0] sm:$0xff]  ;;  %v639_v2 = vld [vmem:[#allocation2 + $0x2b8] sm:$0xff]  ;;  %v638_v4 = vld [vmem:[#allocation2 + $0x2b0] sm:$0xff] }
 0x327   :  { %752 = vmatprep.subr.bf16.mxu0 %v583_v31  ;;  %v643_v3 = vld [vmem:[#allocation2 + $0x2d8] sm:$0xff]  ;;  %v646_v6 = vld [vmem:[#allocation2 + $0x2f0] sm:$0xff]  ;;  %v645_v10 = vld [vmem:[#allocation2 + $0x2e8] sm:$0xff] }
 0x328   :  { %710 = vmatpush1.bf16.msra.mxu1 %v580_v28  ;;  %v651_v5 = vld [vmem:[#allocation2 + $0x318] sm:$0xff]  ;;  %v650_v8 = vld [vmem:[#allocation2 + $0x310] sm:$0xff]  ;;  %v653_v13 = vld [vmem:[#allocation2 + $0x328] sm:$0xff] }
 0x329   :  { %711 = vmatprep.subr.bf16.mxu1 %v588_v30  ;;  %v658_v12 = vld [vmem:[#allocation2 + $0x350] sm:$0xff]  ;;  %v657_v14 = vld [vmem:[#allocation2 + $0x348] sm:$0xff]  ;;  %v652_v15 = vld [vmem:[#allocation2 + $0x320] sm:$0xff] }
 0x32a   :  { %753 = vmatpush1.bf16.msra.mxu0 %v582_v33  ;;  %v557_v16 = vld [vmem:[#allocation2 + $0x28] sm:$0xff]  ;;  %v660_v17 = vld [vmem:[#allocation2 + $0x360] sm:$0xff]  ;;  %v659_v20 = vld [vmem:[#allocation2 + $0x358] sm:$0xff] }
 0x32b   :  { %754 = vmatprep.subr.bf16.mxu0 %v590_v35  ;;  %v556_v19 = vld [vmem:[#allocation2 + $0x20] sm:$0xff]  ;;  %v614_v22 = vld [vmem:[#allocation2 + $0x1f0] sm:$0xff]  ;;  %v563_v23 = vld [vmem:[#allocation2 + $0x58] sm:$0xff] }
 0x32c   :  { %712 = vmatpush1.bf16.msra.mxu1 %v587_v32  ;;  %v564_v21 = vld [vmem:[#allocation2 + $0x60] sm:$0xff]  ;;  %v558_v24 = vld [vmem:[#allocation2 + $0x30] sm:$0xff]  ;;  %v571_v25 = vld [vmem:[#allocation2 + $0x98] sm:$0xff] }
 0x32d   :  { %713 = vmatprep.subr.bf16.mxu1 %v595_v34  ;;  %v621_v26 = vld [vmem:[#allocation2 + $0x228] sm:$0xff]  ;;  %v570_v7 = vld [vmem:[#allocation2 + $0x90] sm:$0xff]  ;;  %v628_v28 = vld [vmem:[#allocation2 + $0x260] sm:$0xff] }
 0x32e   :  { %755 = vmatpush1.bf16.msra.mxu0 %v589_v37  ;;  %v565_v9 = vld [vmem:[#allocation2 + $0x68] sm:$0xff]  ;;  %v578_v27 = vld [vmem:[#allocation2 + $0xd0] sm:$0xff]  ;;  %v572_v30 = vld [vmem:[#allocation2 + $0xa0] sm:$0xff] }
 0x32f   :  { %756 = vmatprep.subr.bf16.mxu0 %v597_v39  ;;  %v577_v29 = vld [vmem:[#allocation2 + $0xc8] sm:$0xff]  ;;  %v635_v32 = vld [vmem:[#allocation2 + $0x298] sm:$0xff]  ;;  %v584_v33 = vld [vmem:[#allocation2 + $0x100] sm:$0xff] }
 0x330   :  { %714 = vmatpush1.bf16.msra.mxu1 %v594_v36  ;;  %v585_v31 = vld [vmem:[#allocation2 + $0x108] sm:$0xff]  ;;  %v579_v34 = vld [vmem:[#allocation2 + $0xd8] sm:$0xff]  ;;  %v592_v35 = vld [vmem:[#allocation2 + $0x140] sm:$0xff] }
 0x331   :  { %715 = vmatprep.subr.bf16.mxu1 %v602_v38  ;;  %v642_v36 = vld [vmem:[#allocation2 + $0x2d0] sm:$0xff]  ;;  %v599_v38 = vld [vmem:[#allocation2 + $0x178] sm:$0xff]  ;;  %v649_v39 = vld [vmem:[#allocation2 + $0x308] sm:$0xff] }
 0x332   :  { %757 = vmatpush1.bf16.msra.mxu0 %v596_v41  ;;  %v586_v37 = vld [vmem:[#allocation2 + $0x110] sm:$0xff]  ;;  %v593_v41 = vld [vmem:[#allocation2 + $0x148] sm:$0xff] }
 0x333   :  { %758 = vmatprep.subr.bf16.mxu0 %v604_v43  ;;  %v656_v43 = vld [vmem:[#allocation2 + $0x340] sm:$0xff] }
 0x334   :  { %716 = vmatpush1.bf16.msra.mxu1 %v601_v40  ;;  %v598_v40 = vld [vmem:[#allocation2 + $0x170] sm:$0xff] }
 0x335   :  { %717 = vmatprep.subr.bf16.mxu1 %v609_v42  ;;  %v606_v42 = vld [vmem:[#allocation2 + $0x1b0] sm:$0xff] }
 0x336   :  { %759 = vmatpush1.bf16.msra.mxu0 %v603_v45  ;;  %v600_v45 = vld [vmem:[#allocation2 + $0x180] sm:$0xff] }
 0x337   :  { %760 = vmatprep.subr.bf16.mxu0 %v611_v47  ;;  %v663_v47 = vld [vmem:[#allocation2 + $0x378] sm:$0xff] }
 0x338   :  { %718 = vmatpush1.bf16.msra.mxu1 %v608_v44  ;;  %v605_v44 = vld [vmem:[#allocation2 + $0x1a8] sm:$0xff] }
 0x339   :  { %719 = vmatprep.subr.bf16.mxu1 %v616_v46  ;;  %v613_v46 = vld [vmem:[#allocation2 + $0x1e8] sm:$0xff] }
 0x33a   :  { %761 = vmatpush1.bf16.msra.mxu0 %v610_v49  ;;  %v607_v49 = vld [vmem:[#allocation2 + $0x1b8] sm:$0xff] }
 0x33b   :  { %762 = vmatprep.subr.bf16.mxu0 %v618_v51  ;;  %v619_v51 = vld [vmem:[#allocation2 + $0x218] sm:$0xff] }
 0x33c   :  { %720 = vmatpush1.bf16.msra.mxu1 %v615_v48  ;;  %v612_v48 = vld [vmem:[#allocation2 + $0x1e0] sm:$0xff] }
 0x33d   :  { %721 = vmatprep.subr.bf16.mxu1 %v623_v50  ;;  %v620_v50 = vld [vmem:[#allocation2 + $0x220] sm:$0xff] }
 0x33e   :  { %763 = vmatpush1.bf16.msra.mxu0 %v617_v53  ;;  %v626_v53 = vld [vmem:[#allocation2 + $0x250] sm:$0xff] }
 0x33f   :  { %764 = vmatprep.subr.bf16.mxu0 %v625_v55  ;;  %v633_v55 = vld [vmem:[#allocation2 + $0x288] sm:$0xff] }
 0x340   :  { %722 = vmatpush1.bf16.msra.mxu1 %v622_v52  ;;  %v627_v52 = vld [vmem:[#allocation2 + $0x258] sm:$0xff] }
 0x341   :  { %723 = vmatprep.subr.bf16.mxu1 %v630_v54  ;;  %v634_v54 = vld [vmem:[#allocation2 + $0x290] sm:$0xff] }
 0x342   :  { %765 = vmatpush1.bf16.msra.mxu0 %v624_v59  ;;  %v640_v59 = vld [vmem:[#allocation2 + $0x2c0] sm:$0xff] }
 0x343   :  { %766 = vmatprep.subr.bf16.mxu0 %v632_v62  ;;  %v647_v62 = vld [vmem:[#allocation2 + $0x2f8] sm:$0xff] }
 0x344   :  { %724 = vmatpush1.bf16.msra.mxu1 %v629_v56  ;;  %v641_v56 = vld [vmem:[#allocation2 + $0x2c8] sm:$0xff] }
 0x345   :  { %725 = vmatprep.subr.bf16.mxu1 %v637_v61  ;;  %v648_v61 = vld [vmem:[#allocation2 + $0x300] sm:$0xff] }
 0x346   :  { %767 = vmatpush1.bf16.msra.mxu0 %v631_v0  ;;  %v654_v0 = vld [vmem:[#allocation2 + $0x330] sm:$0xff] }
 0x347   :  { %768 = vmatprep.subr.bf16.mxu0 %v639_v2  ;;  %v661_v2 = vld [vmem:[#allocation2 + $0x368] sm:$0xff] }
 0x348   :  { %726 = vmatpush1.bf16.msra.mxu1 %v636_v63  ;;  %v655_v63 = vld [vmem:[#allocation2 + $0x338] sm:$0xff] }
 0x349   :  { %727 = vmatprep.subr.bf16.mxu1 %v644_v1  ;;  %v662_v1 = vld [vmem:[#allocation2 + $0x370] sm:$0xff] }
 0x34a   :  { %769 = vmatpush1.bf16.msra.mxu0 %v638_v4 }
 0x34b   :  { %770 = vmatprep.subr.bf16.mxu0 %v646_v6 }
 0x34c   :  { %728 = vmatpush1.bf16.msra.mxu1 %v643_v3  ;;  %v1498_v3 = vld [vmem:[#allocation3] sm:$0xff] }
 0x34d   :  { %729 = vmatprep.subr.bf16.mxu1 %v651_v5  ;;  %v669_v4 = vrot.slane %v1498_v3, %v408_v58  ;;  %v676_v5 = vsub.s32 2, %v1469_v57  ;;  %v673_v6 = vrot.slane %v1498_v3, %v412_v60 }
 0x34e   :  { %771 = vmatpush1.bf16.msra.mxu0 %v645_v10 }
 0x34f   :  { %772 = vmatprep.subr.bf16.mxu0 %v653_v13 }
 0x350   :  { %730 = vmatpush1.bf16.msra.mxu1 %v650_v8  ;;  %v680_v8 = vsub.s32 3, %v1469_v57 }
 0x351   :  { %731 = vmatprep.subr.bf16.mxu1 %v658_v12 }
 0x352   :  { %773 = vmatpush1.bf16.msra.mxu0 %v652_v15 }
 0x353   :  { %774 = vmatprep.subr.bf16.mxu0 %v660_v17  ;;  %v681_v17 = vrot.slane %v1498_v3, %v680_v8 }
 0x354   :  { %732 = vmatpush1.bf16.msra.mxu1 %v657_v14  ;;  %v677_v14 = vrot.slane %v1498_v3, %v676_v5 }
 0x355   :  { %787 = vmatprep.subr.bf16.mxu1 %v557_v16 }
 0x356   :  { %775 = vmatpush1.bf16.msra.mxu0 %v659_v20 }
 0x357   :  { %734 = vmatmul.mubr.bf16.vlgmr.msra.gmra.mrb[4].mxu1 %v1490_v18  ;;  %1069 = vmatprep.subr.bf16.mxu0 %v614_v22 }
 0x358   :  { %788 = vmatpush1.bf16.msra.mxu1 %v556_v19  ;;  %819 = vmatprep.mubr.bf16.mxu1 %v1484_v11 }
 0x359   :  { %789 = vmatprep.subr.bf16.mxu1 %v564_v21  ;;  %777 = vmatmul.mubr.bf16.vlgmr.msra.gmra.mrb[8].mxu0 %v1490_v18 }
 0x35a   :  { %1070 = vmatpush3.bf16.msra.mxu0 %v558_v24  ;;  %862 = vmatprep.mubr.bf16.mxu0 %v1484_v11  ;;  %v591_v11 = vld [vmem:[#allocation2 + $0x138] sm:$0xff] }
 0x35b   :  { %1071 = vmatprep.subr.bf16.mxu0 %v621_v26 }
 0x35c   :  { %790 = vmatpush1.bf16.msra.mxu1 %v563_v23 }
 0x35d   :  { %791 = vmatprep.subr.bf16.mxu1 %v571_v25 }
 0x35e   :  { %1072 = vmatpush3.bf16.msra.mxu0 %v565_v9 }
 0x35f   :  { %1073 = vmatprep.subr.bf16.mxu0 %v628_v28 }
 0x360   :  { %792 = vmatpush1.bf16.msra.mxu1 %v570_v7 }
 0x361   :  { %793 = vmatprep.subr.bf16.mxu1 %v578_v27 }
 0x362   :  { %1074 = vmatpush3.bf16.msra.mxu0 %v572_v30 }
 0x363   :  { %1075 = vmatprep.subr.bf16.mxu0 %v635_v32 }
 0x364   :  { %794 = vmatpush1.bf16.msra.mxu1 %v577_v29 }
 0x365   :  { %795 = vmatprep.subr.bf16.mxu1 %v585_v31 }
 0x366   :  { %1076 = vmatpush3.bf16.msra.mxu0 %v579_v34 }
 0x367   :  { %1077 = vmatprep.subr.bf16.mxu0 %v642_v36 }
 0x368   :  { %796 = vmatpush1.bf16.msra.mxu1 %v584_v33 }
 0x369   :  { %797 = vmatprep.subr.bf16.mxu1 %v592_v35 }
 0x36a   :  { %1078 = vmatpush3.bf16.msra.mxu0 %v586_v37 }
 0x36b   :  { %1079 = vmatprep.subr.bf16.mxu0 %v649_v39 }
 0x36c   :  { %798 = vmatpush1.bf16.msra.mxu1 %v591_v11 }
 0x36d   :  { %799 = vmatprep.subr.bf16.mxu1 %v599_v38 }
 0x36e   :  { %1080 = vmatpush3.bf16.msra.mxu0 %v593_v41 }
 0x36f   :  { %1081 = vmatprep.subr.bf16.mxu0 %v656_v43 }
 0x370   :  { %800 = vmatpush1.bf16.msra.mxu1 %v598_v40 }
 0x371   :  { %801 = vmatprep.subr.bf16.mxu1 %v606_v42 }
 0x372   :  { %1082 = vmatpush3.bf16.msra.mxu0 %v600_v45 }
 0x373   :  { %1083 = vmatprep.subr.bf16.mxu0 %v663_v47 }
 0x374   :  { %802 = vmatpush1.bf16.msra.mxu1 %v605_v44 }
 0x375   :  { %803 = vmatprep.subr.bf16.mxu1 %v613_v46 }
 0x376   :  { %1084 = vmatpush3.bf16.msra.mxu0 %v607_v49 }
 0x378   :  { %804 = vmatpush1.bf16.msra.mxu1 %v612_v48 }
 0x379   :  { %805 = vmatprep.subr.bf16.mxu1 %v620_v50  ;;  %863 = vmatmul.mubr.bf16.vlgmr.msra.gmra.mrb[12].mxu0 %v1490_v18 }
 0x37c   :  { %806 = vmatpush1.bf16.msra.mxu1 %v619_v51 }
 0x37d   :  { %807 = vmatprep.subr.bf16.mxu1 %v627_v52 }
 0x380   :  { %808 = vmatpush1.bf16.msra.mxu1 %v626_v53  ;;  %v692_v53 = vsub.s32 6, %v1469_v57 }
 0x381   :  { %809 = vmatprep.subr.bf16.mxu1 %v634_v54 }
 0x384   :  { %810 = vmatpush1.bf16.msra.mxu1 %v633_v55 }
 0x385   :  { %811 = vmatprep.subr.bf16.mxu1 %v641_v56 }
 0x388   :  { %812 = vmatpush1.bf16.msra.mxu1 %v640_v59 }
 0x389   :  { %813 = vmatprep.subr.bf16.mxu1 %v648_v61  ;;  %v693_v61 = vrot.slane %v1498_v3, %v692_v53 }
 0x38c   :  { %814 = vmatpush1.bf16.msra.mxu1 %v647_v62 }
 0x38d   :  { %815 = vmatprep.subr.bf16.mxu1 %v655_v63 }
 0x390   :  { %816 = vmatpush1.bf16.msra.mxu1 %v654_v0 }
 0x391   :  { %817 = vmatprep.subr.bf16.mxu1 %v662_v1 }
 0x394   :  { %818 = vmatpush1.bf16.msra.mxu1 %v661_v2 }
 0x397   :  { %820 = vmatmul.mubr.bf16.vlgmr.msra.gmra.mrb[8].mxu1 %v1490_v18 }
 0x42a   :  { %v735_v10 = vpop.f32.mrb[4].mxu1 }
 0x42b   :  { %v736_v12 = vadd.f32 %v735_v10, %v669_v4  ;;  %v737_v13 = vpop.f32.mrb[5].mxu1 }
 0x42c   :  { %v738_v15 = vadd.f32 %v737_v13, %v673_v6  ;;  %v739_v16 = vpop.f32.mrb[6].mxu1  ;;  %v778_v22 = vpop.f32.mrb[8].mxu0 }
 0x42d   :  { %v1035_v18 = vmul.f32 -1.442695, %v736_v12  ;;  %v740_v19 = vadd.f32 %v739_v16, %v669_v4  ;;  %v741_v58 = vpop.f32.mrb[7].mxu1  ;;  %v779_v60 = vadd.f32 %v778_v22, %v677_v14  ;;  %v780_v24 = vpop.f32.mrb[9].mxu0  ;;  %v688_v16 = vsub.s32 5, %v1469_v57 }
 0x42e   :  { %v1036_v20 = vmul.f32 -1.442695, %v738_v15  ;;  %v742_v21 = vadd.f32 %v741_v58, %v673_v6  ;;  %v781_v26 = vadd.f32 %v780_v24, %v681_v17  ;;  %v782_v7 = vpop.f32.mrb[10].mxu0  ;;  %v684_v15 = vsub.s32 4, %v1469_v57 }
 0x42f   :  { %1205 = vpow2.f32 %v1035_v18  ;;  %v1042_v23 = vmul.f32 -1.442695, %v740_v19  ;;  %v1037_v9 = vmul.f32 -1.442695, %v779_v60  ;;  %v783_v27 = vadd.f32 %v782_v7, %v677_v14  ;;  %v784_v28 = vpop.f32.mrb[11].mxu0 }
 0x430   :  { %1207 = vpow2.f32 %v1036_v20  ;;  %v1043_v25 = vmul.f32 -1.442695, %v742_v21  ;;  %v1038_v29 = vmul.f32 -1.442695, %v781_v26  ;;  %v785_v30 = vadd.f32 %v784_v28, %v681_v17 }
 0x431   :  { %1209 = vpow2.f32 %v1042_v23  ;;  %v1044_v31 = vmul.f32 -1.442695, %v783_v27  ;;  %v685_v17 = vrot.slane %v1498_v3, %v684_v15  ;;  %v689_v18 = vrot.slane %v1498_v3, %v688_v16 }
 0x432   :  { %1211 = vpow2.f32 %v1043_v25  ;;  %v1045_v32 = vmul.f32 -1.442695, %v785_v30 }
 0x433   :  { %1213 = vpow2.f32 %v1037_v9 }
 0x434   :  { %1215 = vpow2.f32 %v1038_v29 }
 0x435   :  { %1217 = vpow2.f32 %v1044_v31 }
 0x436   :  { %1219 = vpow2.f32 %v1045_v32 }
 0x439   :  { %v1206_v33 = vpop.eup %1205 }
 0x43a   :  { %v1208_v34 = vpop.eup %1207  ;;  %v913_v35 = vadd.f32 1.0, %v1206_v33 }
 0x43b   :  { %v1210_v36 = vpop.eup %1209  ;;  %v914_v11 = vadd.f32 1.0, %v1208_v34 }
 0x43c   :  { %v1212_v37 = vpop.eup %1211  ;;  %1221 = vrcp.f32 %v913_v35  ;;  %v920_v38 = vadd.f32 1.0, %v1210_v36 }
 0x43d   :  { %v1214_v39 = vpop.eup %1213  ;;  %1223 = vrcp.f32 %v914_v11  ;;  %v921_v40 = vadd.f32 1.0, %v1212_v37 }
 0x43e   :  { %v1216_v41 = vpop.eup %1215  ;;  %1225 = vrcp.f32 %v920_v38  ;;  %v915_v42 = vadd.f32 1.0, %v1214_v39 }
 0x43f   :  { %v1218_v43 = vpop.eup %1217  ;;  %1227 = vrcp.f32 %v921_v40  ;;  %v916_v44 = vadd.f32 1.0, %v1216_v41 }
 0x440   :  { %v1220_v45 = vpop.eup %1219  ;;  %1229 = vrcp.f32 %v915_v42  ;;  %v922_v46 = vadd.f32 1.0, %v1218_v43 }
 0x441   :  { %1231 = vrcp.f32 %v916_v44  ;;  %v923_v47 = vadd.f32 1.0, %v1220_v45 }
 0x442   :  { %1233 = vrcp.f32 %v922_v46 }
 0x443   :  { %1235 = vrcp.f32 %v923_v47 }
 0x446   :  { %v1222_v48 = vpop.eup %1221 }
 0x447   :  { %v1224_v49 = vpop.eup %1223  ;;  %955 = vst [vmem:[%s1567_s9] sm:$0xff] %v1222_v48 }
 0x448   :  { %v1226_v50 = vpop.eup %1225  ;;  %956 = vst [vmem:[%s1567_s9 + $0x8] sm:$0xff] %v1224_v49 }
 0x449   :  { %v1228_v51 = vpop.eup %1227  ;;  %962 = vst [vmem:[%s1567_s9 + $0x38] sm:$0xff] %v1226_v50 }
 0x44a   :  { %v1230_v52 = vpop.eup %1229  ;;  %963 = vst [vmem:[%s1567_s9 + $0x40] sm:$0xff] %v1228_v51 }
 0x44b   :  { %v1232_v54 = vpop.eup %1231  ;;  %957 = vst [vmem:[%s1567_s9 + $0x10] sm:$0xff] %v1230_v52 }
 0x44c   :  { %v1234_v55 = vpop.eup %1233  ;;  %958 = vst [vmem:[%s1567_s9 + $0x18] sm:$0xff] %v1232_v54  ;;  %v1085_v59 = vpop.f32.mrb[12].mxu0 }
 0x44d   :  { %v1236_v56 = vpop.eup %1235  ;;  %964 = vst [vmem:[%s1567_s9 + $0x48] sm:$0xff] %v1234_v55  ;;  %v1086_v62 = vpop.f32.mrb[13].mxu0 }
 0x44e   :  { %965 = vst [vmem:[%s1567_s9 + $0x50] sm:$0xff] %v1236_v56  ;;  %v1087_v63 = vadd.f32 %v1086_v62, %v1085_v59  ;;  %v1088_v0 = vpop.f32.mrb[14].mxu0 }
 0x44f   :  { %v1089_v1 = vpop.f32.mrb[15].mxu0 }
 0x450   :  { %v865_v2 = vadd.f32 %v1087_v63, %v693_v61  ;;  %v1090_v4 = vadd.f32 %v1089_v1, %v1088_v0 }
 0x452   :  { %v1041_v5 = vmul.f32 -1.442695, %v865_v2  ;;  %v868_v6 = vadd.f32 %v1090_v4, %v693_v61 }
 0x454   :  { %1237 = vpow2.f32 %v1041_v5  ;;  %v1048_v8 = vmul.f32 -1.442695, %v868_v6 }
 0x456   :  { %1239 = vpow2.f32 %v1048_v8 }
 0x45e   :  { %v1238_v10 = vpop.eup %1237 }
 0x45f   :  { %v919_v12 = vadd.f32 1.0, %v1238_v10 }
 0x460   :  { %v1240_v13 = vpop.eup %1239 }
 0x461   :  { %1241 = vrcp.f32 %v919_v12  ;;  %v926_v14 = vadd.f32 1.0, %v1240_v13 }
 0x463   :  { %1243 = vrcp.f32 %v926_v14 }
 0x46a   :  { %v821_v19 = vpop.f32.mrb[8].mxu1 }
 0x46b   :  { %v822_v58 = vadd.f32 %v821_v19, %v685_v17  ;;  %v823_v20 = vpop.f32.mrb[9].mxu1  ;;  %v1242_v23 = vpop.eup %1241 }
 0x46c   :  { %v824_v21 = vadd.f32 %v823_v20, %v689_v18  ;;  %v825_v22 = vpop.f32.mrb[10].mxu1  ;;  %961 = vst [vmem:[%s1567_s9 + $0x30] sm:$0xff] %v1242_v23 }
 0x46d   :  { %v1039_v60 = vmul.f32 -1.442695, %v822_v58  ;;  %v826_v24 = vadd.f32 %v825_v22, %v685_v17  ;;  %v827_v25 = vpop.f32.mrb[11].mxu1  ;;  %v1244_v7 = vpop.eup %1243 }
 0x46e   :  { %v1040_v26 = vmul.f32 -1.442695, %v824_v21  ;;  %v828_v57 = vadd.f32 %v827_v25, %v689_v18  ;;  %968 = vst [vmem:[%s1567_s9 + $0x68] sm:$0xff] %v1244_v7 }
 0x46f   :  { %1245 = vpow2.f32 %v1039_v60  ;;  %v1046_v9 = vmul.f32 -1.442695, %v826_v24 }
 0x470   :  { %1247 = vpow2.f32 %v1040_v26  ;;  %v1047_v3 = vmul.f32 -1.442695, %v828_v57 }
 0x471   :  { %1249 = vpow2.f32 %v1046_v9 }
 0x472   :  { %1251 = vpow2.f32 %v1047_v3 }
 0x479   :  { %v1246_v27 = vpop.eup %1245 }
 0x47a   :  { %v1248_v28 = vpop.eup %1247  ;;  %v917_v29 = vadd.f32 1.0, %v1246_v27 }
 0x47b   :  { %v1250_v30 = vpop.eup %1249  ;;  %v918_v31 = vadd.f32 1.0, %v1248_v28 }
 0x47c   :  { %v1252_v32 = vpop.eup %1251  ;;  %1253 = vrcp.f32 %v917_v29  ;;  %v924_v33 = vadd.f32 1.0, %v1250_v30 }
 0x47d   :  { %1255 = vrcp.f32 %v918_v31  ;;  %v925_v34 = vadd.f32 1.0, %v1252_v32 }
 0x47e   :  { %1257 = vrcp.f32 %v924_v33 }
 0x47f   :  { %1259 = vrcp.f32 %v925_v34 }
 0x486   :  { %v1254_v35 = vpop.eup %1253 }
 0x487   :  { %v1256_v36 = vpop.eup %1255  ;;  %959 = vst [vmem:[%s1567_s9 + $0x20] sm:$0xff] %v1254_v35 }
 0x488   :  { %v1258_v11 = vpop.eup %1257  ;;  %960 = vst [vmem:[%s1567_s9 + $0x28] sm:$0xff] %v1256_v36 }
 0x489   :  { %v1260_v37 = vpop.eup %1259  ;;  %966 = vst [vmem:[%s1567_s9 + $0x58] sm:$0xff] %v1258_v11 }
 0x48a   :  { %967 = vst [vmem:[%s1567_s9 + $0x60] sm:$0xff] %v1260_v37 }
 0x48b   :  { %973 = vsyncpa [#allocation6], 1 }
 0x48c   :  { %974 = vsyncpa [#allocation8], 1 }
 0x48d   :  { %975 = vsyncmov [#allocation4] }
 0x490   :  { %s976_s23 = vpop.sfrf %975 }
 0x491   :  { %p1049_p10 = scmp.ne.s32.totalorder %s976_s23, 0 }
 0x493   :  { %980 = shalt.err (%p1049_p10)  }
 0x494   :  { %982 = vsyncmov [#allocation4 + $0x1] }
 0x497   :  { %s983_s24 = vpop.sfrf %982 }
 0x498   :  { %p1050_p11 = scmp.ne.s32.totalorder %s983_s24, 0 }
 0x49a   :  { %987 = shalt.err (%p1050_p11)  }

</bundles_post_ra>
